<compile_context>
chip_gen: v7x
topology: tpu7x:2x2x1
jax: 0.10.0
libtpu: 0.0.40
codegen_flags: <defaults>
</compile_context>

<pallas_src>
import functools

import jax
import jax.numpy as jnp
from jax.experimental import pallas as pl
from jax.experimental.pallas import tpu as pltpu


def _round_up(x, m):
    return ((x + m - 1) // m) * m


def _cnet_kernel(x_ref, w_ref, b_ref, o_ref, acc_ref, *, inv_hw, lane_groups):
    # x_ref:  (TB, C, THW)   input tile, native dtype
    # w_ref:  (C, O_pad)     weights (already transposed), native dtype
    # b_ref:  (1, O_pad)     bias
    # o_ref:  (TB, O_pad)    output tile
    # acc_ref:(TB, C, 128)   f32 lane-width spatial-sum accumulator
    h = pl.program_id(1)

    @pl.when(h == 0)
    def _init():
        acc_ref[...] = jnp.zeros_like(acc_ref)

    # Partial spatial sums: 128-lane-aligned slabs, element-wise adds only
    # (VALU); the cross-lane reduce is deferred to the finalize step.
    part = x_ref[:, :, 0:128].astype(jnp.float32)
    for g in range(1, lane_groups):
        part = part + x_ref[:, :, g * 128:(g + 1) * 128].astype(jnp.float32)
    acc_ref[...] += part

    @pl.when(h == pl.num_programs(1) - 1)
    def _finalize():
        # Global average pool (divide by the true H*W, not the padded count).
        pooled = jnp.sum(acc_ref[...], axis=-1) * inv_hw          # (TB, C) f32
        # Linear layer on the MXU with an f32 accumulator.
        y = jnp.dot(pooled.astype(w_ref.dtype), w_ref[...],
                    preferred_element_type=jnp.float32)           # (TB, O_pad)
        y = y + b_ref[...].astype(jnp.float32)
        # relu1: torch.clamp(x, 0, 1) -- single lane-dense store.
        o_ref[...] = jnp.clip(y, 0.0, 1.0).astype(o_ref.dtype)


def cnet_forward(x_nchw, weight, bias):
    """x_nchw: (B, C, H, W); weight: (O, C) (PyTorch layout); bias: (O,)."""
    B, C, H, W = x_nchw.shape
    O = weight.shape[0]
    HW = H * W

    # ---- tile sizing -------------------------------------------------------
    # Batch tile: full B when small / not 8-divisible, else 8 rows per tile.
    tb = 8 if (B > 8 and B % 8 == 0) else B

    # Spatial tile: multiple of 128 lanes, sized from a conservative VMEM
    # budget (~6 MiB per input buffer -> ~12 MiB double-buffered; fits the
    # default scoped VMEM limits on v5e/v6e/v7x without raising them).
    dtype_bytes = jnp.dtype(x_nchw.dtype).itemsize
    budget = 6 * 1024 * 1024
    max_thw = max(128, (budget // max(1, tb * C * dtype_bytes)) // 128 * 128)
    thw = int(min(max_thw, 2048, _round_up(HW, 128)))
    hw_pad = _round_up(HW, thw)
    lane_groups = thw // 128

    # ---- operand prep (cheap/free glue in XLA) -----------------------------
    x3 = x_nchw.reshape(B, C, HW)                       # free reshape (NCHW)
    if hw_pad != HW:                                    # zero-pad spatial dim
        x3 = jnp.pad(x3, ((0, 0), (0, 0), (0, hw_pad - HW)))

    o_pad = _round_up(O, 128)                           # lane-dense output
    w_p = weight if o_pad == O else jnp.pad(weight, ((0, o_pad - O), (0, 0)))
    b_p = bias if o_pad == O else jnp.pad(bias, ((0, o_pad - O),))
    w_t = w_p.T                                         # (C, O_pad)
    b2d = b_p.reshape(1, o_pad)

    grid = (B // tb, hw_pad // thw)

    kernel = functools.partial(_cnet_kernel,
                               inv_hw=float(1.0 / HW),
                               lane_groups=lane_groups)

    out_bytes = jnp.dtype(x_nchw.dtype).itemsize
    cost = pl.CostEstimate(
        flops=int(B * C * hw_pad + 2 * B * C * o_pad + B * o_pad),
        transcendentals=0,
        bytes_accessed=int(x3.size * dtype_bytes
                           + w_t.size * jnp.dtype(w_t.dtype).itemsize
                           + b2d.size * jnp.dtype(b2d.dtype).itemsize
                           + B * o_pad * out_bytes),
    )

    out = pl.pallas_call(
        kernel,
        out_shape=jax.ShapeDtypeStruct((B, o_pad), x_nchw.dtype),
        grid_spec=pltpu.PrefetchScalarGridSpec(
            num_scalar_prefetch=0,
            grid=grid,
            in_specs=[
                pl.BlockSpec((tb, C, thw), lambda b, h: (b, 0, h)),
                pl.BlockSpec((C, o_pad), lambda b, h: (0, 0)),
                pl.BlockSpec((1, o_pad), lambda b, h: (0, 0)),
            ],
            out_specs=pl.BlockSpec((tb, o_pad), lambda b, h: (b, 0)),
            scratch_shapes=[pltpu.VMEM((tb, C, 128), jnp.float32)],
        ),
        compiler_params=pltpu.CompilerParams(
            dimension_semantics=("parallel", "arbitrary"),
        ),
        cost_estimate=cost,
    )(x3, w_t, b2d)

    return out[:, :O] if o_pad != O else out


def _reference(x_nchw, weight, bias):
    pooled = jnp.mean(x_nchw, axis=(2, 3))              # (B, C)
    y = pooled @ weight.T + bias
    return jnp.clip(y, 0.0, 1.0)


if __name__ == "__main__":
    key = jax.random.PRNGKey(0)
    B, C, H, W = 2, 4, 16, 16
    O = 8

    kx, kw, kb = jax.random.split(key, 3)
    x = jax.random.normal(kx, (B, C, H, W), dtype=jnp.float32)
    # Deterministic "Linear" parameters (same shapes as nn.Linear(C, O)).
    bound = 1.0 / (C ** 0.5)
    weight = jax.random.uniform(kw, (O, C), minval=-bound, maxval=bound,
                                dtype=jnp.float32)
    bias = jax.random.uniform(kb, (O,), minval=-bound, maxval=bound,
                              dtype=jnp.float32)

    out = cnet_forward(x, weight, bias)
    jax.block_until_ready(out)

    ref = _reference(x, weight, bias)
    assert out.shape == (B, O)
    assert jnp.allclose(out, ref, atol=1e-5, rtol=1e-5)
    print("KERNEL_OK")
</pallas_src>

<mosaic_0001>
module attributes {stable_mosaic.version = 11 : i64} {
  func.func @_cnet_kernel(%arg0: i32, %arg1: i32, %arg2: memref<2x4x256xf32, #tpu.memory_space<vmem>>, %arg3: memref<4x128xf32, #tpu.memory_space<vmem>>, %arg4: memref<1x128xf32, #tpu.memory_space<vmem>>, %arg5: memref<2x128xf32, #tpu.memory_space<vmem>>, %arg6: memref<2x4x128xf32, #tpu.memory_space<vmem>>) attributes {dimension_semantics = [#tpu.dimension_semantics<parallel>, #tpu.dimension_semantics<arbitrary>], iteration_bounds = array<i64: 1, 1>, scalar_prefetch = 0 : i64, scratch_operands = 1 : i64, tpu.core_type = #tpu.core_type<tc>, window_params = [{transform_indices = @transform_0, window_bounds = array<i64: 2, 4, 256>}, {pipeline_mode = #tpu.pipeline_mode<synchronous>, transform_indices = @transform_1, window_bounds = array<i64: 4, 128>}, {pipeline_mode = #tpu.pipeline_mode<synchronous>, transform_indices = @transform_2, window_bounds = array<i64: 1, 128>}, {transform_indices = @transform_3, window_bounds = array<i64: 2, 128>}]} {
    %c0_i32 = arith.constant 0 : i32
    %0 = arith.cmpi eq, %arg1, %c0_i32 : i32
    %1 = arith.extui %0 : i1 to i32
    %c0_i32_0 = arith.constant 0 : i32
    %2 = arith.cmpi ne, %1, %c0_i32_0 : i32
    scf.if %2 {
      %cst = arith.constant 0.000000e+00 : f32
      %12 = vector.broadcast %cst : f32 to vector<2x4x128xf32>
      %c0_13 = arith.constant 0 : index
      %c0_14 = arith.constant 0 : index
      %c0_15 = arith.constant 0 : index
      %13 = vector.load %arg6[%c0_13, %c0_14, %c0_15] : memref<2x4x128xf32, #tpu.memory_space<vmem>>, vector<2x4x128xf32>
      tpu.vector_store %arg6[%c0_13, %c0_14, %c0_15], %12 {strides = array<i32>} : memref<2x4x128xf32, #tpu.memory_space<vmem>>, vector<2x4x128xf32>,
    } else {
    }
    %c0 = arith.constant 0 : index
    %c0_1 = arith.constant 0 : index
    %c0_2 = arith.constant 0 : index
    %3 = vector.load %arg2[%c0, %c0_1, %c0_2] : memref<2x4x256xf32, #tpu.memory_space<vmem>>, vector<2x4x128xf32>
    %c0_3 = arith.constant 0 : index
    %c0_4 = arith.constant 0 : index
    %c128 = arith.constant 128 : index
    %4 = vector.load %arg2[%c0_3, %c0_4, %c128] : memref<2x4x256xf32, #tpu.memory_space<vmem>>, vector<2x4x128xf32>
    %5 = arith.addf %3, %4 : vector<2x4x128xf32>
    %c0_5 = arith.constant 0 : index
    %c0_6 = arith.constant 0 : index
    %c0_7 = arith.constant 0 : index
    %6 = vector.load %arg6[%c0_5, %c0_6, %c0_7] : memref<2x4x128xf32, #tpu.memory_space<vmem>>, vector<2x4x128xf32>
    %7 = arith.addf %6, %5 : vector<2x4x128xf32>
    %c0_8 = arith.constant 0 : index
    %c0_9 = arith.constant 0 : index
    %c0_10 = arith.constant 0 : index
    %8 = vector.load %arg6[%c0_8, %c0_9, %c0_10] : memref<2x4x128xf32, #tpu.memory_space<vmem>>, vector<2x4x128xf32>
    tpu.vector_store %arg6[%c0_8, %c0_9, %c0_10], %7 {strides = array<i32>} : memref<2x4x128xf32, #tpu.memory_space<vmem>>, vector<2x4x128xf32>,
    %c0_i32_11 = arith.constant 0 : i32
    %9 = arith.cmpi eq, %arg1, %c0_i32_11 : i32
    %10 = arith.extui %9 : i1 to i32
    %c0_i32_12 = arith.constant 0 : i32
    %11 = arith.cmpi ne, %10, %c0_i32_12 : i32
    scf.if %11 {
      %c0_13 = arith.constant 0 : index
      %c0_14 = arith.constant 0 : index
      %c0_15 = arith.constant 0 : index
      %12 = vector.load %arg6[%c0_13, %c0_14, %c0_15] : memref<2x4x128xf32, #tpu.memory_space<vmem>>, vector<2x4x128xf32>
      %cst = arith.constant dense<0.000000e+00> : vector<2x4xf32>
      %13 = vector.multi_reduction <add>, %12, %cst [2] : vector<2x4x128xf32> to vector<2x4xf32>
      %cst_16 = arith.constant 3.906250e-03 : f32
      %14 = vector.broadcast %cst_16 : f32 to vector<2x4xf32>
      %15 = arith.mulf %13, %14 : vector<2x4xf32>
      %c0_17 = arith.constant 0 : index
      %c0_18 = arith.constant 0 : index
      %16 = vector.load %arg3[%c0_17, %c0_18] : memref<4x128xf32, #tpu.memory_space<vmem>>, vector<4x128xf32>
      %cst_19 = arith.constant dense<0.000000e+00> : vector<2x128xf32>
      %17 = tpu.matmul %15, %16, %cst_19 {dimension_numbers = #tpu.dot_dimension_numbers<[1], [0], [0], [1], [0, 0, 1, 1], [], []>} : vector<2x4xf32>, vector<4x128xf32>, vector<2x128xf32> -> vector<2x128xf32>
      %c0_20 = arith.constant 0 : index
      %c0_21 = arith.constant 0 : index
      %18 = vector.load %arg4[%c0_20, %c0_21] : memref<1x128xf32, #tpu.memory_space<vmem>>, vector<1x128xf32>
      %19 = vector.broadcast %18 : vector<1x128xf32> to vector<2x128xf32>
      %20 = arith.addf %17, %19 : vector<2x128xf32>
      %cst_22 = arith.constant 0.000000e+00 : f32
      %cst_23 = arith.constant 1.000000e+00 : f32
      %21 = vector.broadcast %cst_22 : f32 to vector<2x128xf32>
      %22 = arith.maximumf %21, %20 : vector<2x128xf32>
      %23 = vector.broadcast %cst_23 : f32 to vector<2x128xf32>
      %24 = arith.minimumf %23, %22 : vector<2x128xf32>
      %c0_24 = arith.constant 0 : index
      %c0_25 = arith.constant 0 : index
      %25 = vector.load %arg5[%c0_24, %c0_25] : memref<2x128xf32, #tpu.memory_space<vmem>>, vector<2x128xf32>
      tpu.vector_store %arg5[%c0_24, %c0_25], %24 {strides = array<i32>} : memref<2x128xf32, #tpu.memory_space<vmem>>, vector<2x128xf32>,
    } else {
    }
    return
  }
  func.func @transform_0(%arg0: i32, %arg1: i32) -> (i32, i32, i32) {
    %c0_i32 = arith.constant 0 : i32
    %c0_i32_0 = arith.constant 0 : i32
    return %arg0, %c0_i32, %arg1 : i32, i32, i32
  }
  func.func @transform_1(%arg0: i32, %arg1: i32) -> (i32, i32) {
    %c0_i32 = arith.constant 0 : i32
    %c0_i32_0 = arith.constant 0 : i32
    %c0_i32_1 = arith.constant 0 : i32
    return %c0_i32, %c0_i32_0 : i32, i32
  }
  func.func @transform_2(%arg0: i32, %arg1: i32) -> (i32, i32) {
    %c0_i32 = arith.constant 0 : i32
    %c0_i32_0 = arith.constant 0 : i32
    %c0_i32_1 = arith.constant 0 : i32
    return %c0_i32, %c0_i32_0 : i32, i32
  }
  func.func @transform_3(%arg0: i32, %arg1: i32) -> (i32, i32) {
    %c0_i32 = arith.constant 0 : i32
    %c0_i32_0 = arith.constant 0 : i32
    return %arg0, %c0_i32 : i32, i32
  }
}

</mosaic_0001>

<bundles_post_ra>
// kernel: tpu_custom_call.1
= control target key start
LH: loop header
LB: loop body
LE: loop exit
PB: predicated region body
PF: predicated region fallthrough
CT: control target
= control target key end

     0   :  { %8 = vsyncpa [#allocation4], 0  ;;  %s345_s0 = inlined_call_operand.hbm [shape: f32[2,4,256], index: 0, kind: input, shape index: {}]   ;;  %s346_s1 = inlined_call_operand.hbm [shape: f32[4,128], index: 1, kind: input, shape index: {}]   ;;  %s347_s2 = inlined_call_operand.vmem [shape: f32[1,128], index: 2, kind: input, shape index: {}]   ;;  %s348_s3 = inlined_call_operand.hbm [shape: f32[2,128], index: 3, kind: output, shape index: {}]  }
   0x1   :  { %9 = vsyncpa [#allocation7], 0 }
   0x2   :  { %10 = vsyncpa [#allocation5], 0  ;;  %s279_s12 = smov [#allocation3]   ;;  %s207_s16 = scalar_lea.hbm %s345_s0, 256 }
   0x3   :  { %s16_s13 = sshll.u32 %s279_s12, 4  ;;  %p208_p0 = scmp.ne.s32.totalorder %s345_s0, %s207_s16  ;;  %s17_s13 = int_to_ptr.vmem [resolvable:$true] %s16_s13 }
   0x4   :  { %p211_p1 = scmp.lt.u32.totalorder %s207_s16, %s345_s0 }
   0x6   :  { %p213_p2 = pnand %p211_p1, %p208_p0 }
   0x8   :  { %216 = shalt.err (!%p213_p2)
}
   0x9   :  { %s217_s21 = scalar_lea.vmem %s17_s13, 256  ;;  %p222_p4 = scmp.lt.s32.totalorder %s17_s13, %s17_s13 }
   0xa   :  { %p218_p3 = scmp.ne.s32.totalorder %s17_s13, %s217_s21  ;;  %p223_p5 = scmp.lt.s32.totalorder %s217_s21, %s217_s21 }
   0xc   :  { %p224_p6 = por %p223_p5, %p222_p4 }
   0xe   :  { %p225_p7 = pnand %p224_p6, %p218_p3 }
  0x10   :  { %228 = shalt.err (!%p225_p7)
}
  0x11   :  { %s280_s22 = smov 128   ;;  %s281_s23 = smov 8  }
  0x12   :  { %22 = dma.hbm_to_vmem [thread:$0]  %s345_s0, 256, %s17_s13, [#allocation4], %s280_s22, %s280_s22, %s281_s23  }
  0x13   :  { %s282_s26 = smov [#allocation6]   ;;  %s229_s30 = scalar_lea.hbm %s346_s1, 64 }
  0x14   :  { %s29_s27 = sshll.u32 %s282_s26, 4  ;;  %p230_p8 = scmp.ne.s32.totalorder %s346_s1, %s229_s30  ;;  %s30_s27 = int_to_ptr.vmem [resolvable:$true] %s29_s27 }
  0x15   :  { %p233_p9 = scmp.lt.u32.totalorder %s229_s30, %s346_s1 }
  0x17   :  { %p235_p10 = pnand %p233_p9, %p230_p8 }
  0x19   :  { %238 = shalt.err (!%p235_p10)
}
  0x1a   :  { %s239_s8 = scalar_lea.vmem %s30_s27, 64  ;;  %p244_p12 = scmp.lt.s32.totalorder %s30_s27, %s30_s27 }
  0x1b   :  { %p240_p11 = scmp.ne.s32.totalorder %s30_s27, %s239_s8  ;;  %p245_p13 = scmp.lt.s32.totalorder %s239_s8, %s239_s8 }
  0x1d   :  { %p246_p0 = por %p245_p13, %p244_p12 }
  0x1f   :  { %p247_p1 = pnand %p246_p0, %p240_p11 }
  0x21   :  { %250 = shalt.err (!%p247_p1)
}
  0x22   :  { %32 = dma.hbm_to_vmem [thread:$0]  %s346_s1, 64, %s30_s27, [#allocation7]  }
  0x23   :  { %273 = dma.done.wait [#allocation4], 256  }
  0x24   :  { %274 = vsyncadd [#allocation4], 4294967040 }
  0x25   :  { %275 = dma.done.wait [#allocation7], 64  }
  0x26   :  { %276 = vsyncadd [#allocation7], 4294967232  ;;  %v283_v0 = vmov 0.0   ;;  %v47_v1 = vld [vmem:[#allocation3] sm:$0xf]  ;;  %vm64_vm0 = vcmask 1043456   ;;  %v83_v16 = vlaneseq }
  0x27   :  { %45 = vst [vmem:[#allocation2] sm:$0xf] %v283_v0  ;;  %46 = vst [vmem:[#allocation2 + $0x4] sm:$0xf] %v283_v0  ;;  %195 = vmatprep.subr.mxu0 %v283_v0  ;;  %v49_v2 = vld [vmem:[#allocation3 + $0x4] sm:$0xf] }
  0x28   :  { %v48_v3 = vld [vmem:[#allocation3 + $0x8] sm:$0xf]  ;;  %v51_v4 = vadd.f32 %v49_v2, %v47_v1  ;;  %v50_v6 = vld [vmem:[#allocation3 + $0xc] sm:$0xf]  ;;  %v73_v15 = vld [vmem:[#allocation6] sm:$0xf] }
  0x29   :  { %v52_v8 = vadd.f32 %v50_v6, %v48_v3  ;;  %196 = vmatpush3.msk.msra.mxu0 %vm64_vm0, %v73_v15  ;;  %vm284_vm1 = vmmov 0   ;;  %v84_v17 = vand.u32 127, %v83_v16  ;;  %v86_v18 = vshrl.u32 %v83_v16, 7  ;;  %v190_v27 = vld [vmem:[%s347_s2] ss:$0 sm:$0xff]  ;;  %s285_s11 = smov [#allocation8]  }
  0x2a   :  { %197 = vmatprep.mubr.msk.f32.mxu0 %vm284_vm1, %v283_v0  ;;  %vm93_vm2 = vcmask 1041409   ;;  %vm95_vm3 = vcmask 31744   ;;  %s180_s12 = sshll.u32 %s285_s11, 4  ;;  %s181_s12 = int_to_ptr.vmem [resolvable:$true] %s180_s12 }
  0x2b   :  { %v87_v20 = vsub.s32 %v84_v17, %v86_v18  ;;  %s251_s13 = scalar_lea.vmem %s181_s12, 32  ;;  %p256_p3 = scmp.lt.s32.totalorder %s181_s12, %s181_s12 }
  0x2c   :  { %p252_p2 = scmp.ne.s32.totalorder %s181_s12, %s251_s13  ;;  %p257_p4 = scmp.lt.s32.totalorder %s251_s13, %s251_s13 }
  0x2e   :  { %v53_v5 = vld [vmem:[#allocation2] sm:$0xf]  ;;  %v54_v7 = vld [vmem:[#allocation2 + $0x4] sm:$0xf]  ;;  %p258_p5 = por %p257_p4, %p256_p3 }
  0x2f   :  { %v55_v9 = vadd.f32 %v53_v5, %v51_v4  ;;  %v56_v10 = vadd.f32 %v54_v7, %v52_v8 }
  0x30   :  { %p259_p6 = pnand %p258_p5, %p252_p2 }
  0x31   :  { %57 = vst [vmem:[#allocation2] sm:$0xf] %v55_v9  ;;  %58 = vst [vmem:[#allocation2 + $0x4] sm:$0xf] %v56_v10 }
  0x38   :  { %v62_v11 = vld [vmem:[#allocation2] sm:$0xf]  ;;  %v63_v13 = vld [vmem:[#allocation2 + $0x4] sm:$0xf] }
  0x39   :  { %v65_v12 = vsel %vm64_vm0, %v62_v11, 0.0  ;;  %v68_v14 = vsel %vm64_vm0, %v63_v13, 0.0 }
  0x3a   :  { %66 = vadd.xlane.f32.xlu0 %v65_v12 }
  0x3e   :  { %69 = vadd.xlane.f32.xlu0 %v68_v14 }
  0xc7   :  { %v67_v19 = vpop.xlane.xlu0 %66 }
  0xc8   :  { %v71_v21 = vmul.f32 0.00390625, %v67_v19 }
  0xca   :  { %v88_v24 = vrot.slane %v71_v21, %v87_v20 }
  0xcb   :  { %v70_v22 = vpop.xlane.xlu0 %69 }
  0xcc   :  { %v72_v23 = vmul.f32 0.00390625, %v70_v22 }
  0xce   :  { %v92_v25 = vrot.slane %v72_v23, %v87_v20 }
  0xd0   :  { %v94_v26 = vsel %vm93_vm2, %v92_v25, %v88_v24 }
  0xd1   :  { %198 = vmatmul.mubr.msk.f32.vlgmr.msra.gmra.mrb[0].mxu0 %vm95_vm3, %v94_v26 }
 0x1a4   :  { %v167_v28 = vpop.f32.mrb[0].mxu0 }
 0x1a5   :  { %v168_v29 = vadd.f32 %v190_v27, %v167_v28  ;;  %v199_v30 = vpop.f32.mrb[1].mxu0 }
 0x1a7   :  { %v171_v31 = vmax.f32 %v168_v29, 0.0 }
 0x1a9   :  { %v172_v32 = vmin.f32 %v171_v31, 1.0 }
 0x1ab   :  { %173 = vst [vmem:[#allocation8] sm:$0x3] %v172_v32 }
 0x1ac   :  { %262 = shalt.err (!%p259_p6)
}
 0x1ad   :  { %s263_s2 = scalar_lea.hbm %s348_s3, 32 }
 0x1ae   :  { %p264_p7 = scmp.ne.s32.totalorder %s348_s3, %s263_s2  ;;  %p267_p8 = scmp.lt.u32.totalorder %s263_s2, %s348_s3 }
 0x1b0   :  { %p269_p9 = pnand %p267_p8, %p264_p7 }
 0x1b2   :  { %272 = shalt.err (!%p269_p9)
}
 0x1b3   :  { %183 = dma.vmem_to_hbm [thread:$0]  %s181_s12, 32, %s348_s3, [#allocation5]  }
 0x1b4   :  { %277 = dma.done.wait [#allocation5], 32  }
 0x1b5   :  { %278 = vsyncadd [#allocation5], 4294967264 }
 0x1b6   :  { %187 = vsyncpa [#allocation4], 1 }
 0x1b7   :  { %188 = vsyncpa [#allocation7], 1 }
 0x1b8   :  { %189 = vsyncpa [#allocation5], 1 }

</bundles_post_ra>
